<compile_context>
chip_gen: v7x
topology: tpu7x:2x2x1
jax: 0.10.0
libtpu: 0.0.40
codegen_flags: <defaults>
</compile_context>

<pallas_src>
import functools
import math

import jax
import jax.numpy as jnp
from jax.experimental import pallas as pl
from jax.experimental.pallas import tpu as pltpu


# Per-grid-step footprint budget for the double-buffered in+out blocks
# (layout-padded bytes).  Safe under every chip's scoped-VMEM default while
# already on the streaming-copy roofline plateau (blocks of a few MiB).
_VMEM_STEP_BUDGET = 12 * 1024 * 1024
# Never request more scoped VMEM than this (v7x has only 64 MiB physical).
_VMEM_LIMIT_CAP = 48 * 1024 * 1024
# Below this total byte count, fuse the two pads into one pallas_call.
_FUSE_BYTES_THRESHOLD = 4 * 1024 * 1024


def _round_up(x, m):
    return ((x + m - 1) // m) * m


def _sublane_multiple(dtype):
    # f32 -> 8, bf16 -> 16, int8/fp8 -> 32 (sub-32-bit packs along sublanes).
    return max(8, 32 // jnp.dtype(dtype).itemsize)


def _padded_plane_bytes(h, w, dtype):
    """VMEM bytes of one (h, w) plane with (sublane, 128-lane) layout padding."""
    dt = jnp.dtype(dtype)
    return _round_up(h, _sublane_multiple(dt)) * _round_up(w, 128) * dt.itemsize


def _pad_tile(x, th, tw):
    """Pad a (nt, h, w) tile to (nt, th, tw) with zeros at bottom/right.

    Built as one value so the caller can issue a single full-tile store
    (no masked partial stores at lane offset w / sublane offset h).
    """
    nt, h, w = x.shape
    if tw > w:
        x = jnp.concatenate([x, jnp.zeros((nt, h, tw - w), x.dtype)], axis=-1)
    if th > h:
        x = jnp.concatenate([x, jnp.zeros((nt, th - h, tw), x.dtype)], axis=1)
    return x


def _pad2d_kernel(x_ref, o_ref, *, th, tw):
    # One read of the input block, one full-tile store of the output block.
    o_ref[...] = _pad_tile(x_ref[...], th, tw)


def _pad_flat(x3, th, tw):
    """Pad (n, h, w) -> (n, th, tw) with zeros at bottom/right via one pallas_call."""
    n, h, w = x3.shape
    dtype = x3.dtype
    assert th >= h and tw >= w

    per_item = _padded_plane_bytes(h, w, dtype) + _padded_plane_bytes(th, tw, dtype)

    if 2 * per_item > _VMEM_LIMIT_CAP:
        # TODO(synk): extremely large single planes would need a second (row)
        # tiling level; fall back to XLA's pad for that regime.
        return jnp.pad(x3, ((0, 0), (0, th - h), (0, tw - w)))

    # Largest block that fits the double-buffered budget; at least 2 grid steps
    # when n >= 2 (v7x megacore).  cdiv grid -> no divisor search, no nt=1
    # degeneration for awkward/prime n; last (ragged) block is masked by Pallas.
    nt = max(1, min(n, _VMEM_STEP_BUDGET // (2 * per_item)))
    if n >= 2:
        nt = min(nt, pl.cdiv(n, 2))
    grid = (pl.cdiv(n, nt),)

    needed = 2 * nt * per_item
    params = {"dimension_semantics": ("parallel",)}
    if needed > _VMEM_STEP_BUDGET:
        # Only possible when a single item exceeds the budget (nt == 1).
        params["vmem_limit_bytes"] = int(min(_VMEM_LIMIT_CAP, needed + (4 << 20)))

    itemsize = jnp.dtype(dtype).itemsize
    bytes_accessed = n * (h * w + th * tw) * itemsize

    return pl.pallas_call(
        functools.partial(_pad2d_kernel, th=th, tw=tw),
        out_shape=jax.ShapeDtypeStruct((n, th, tw), dtype),
        grid=grid,
        in_specs=[pl.BlockSpec((nt, h, w), lambda i: (i, 0, 0))],
        out_specs=pl.BlockSpec((nt, th, tw), lambda i: (i, 0, 0)),
        compiler_params=pltpu.CompilerParams(**params),
        cost_estimate=pl.CostEstimate(
            flops=0, transcendentals=0, bytes_accessed=bytes_accessed
        ),
    )(x3)


def pad_to_target_2d(x, target_hw):
    """Zero-pad the last two dims of `x` (rank >= 2) up to `target_hw`."""
    th, tw = int(target_hw[0]), int(target_hw[1])
    if x.ndim < 2:
        raise ValueError("pad_to_target_2d expects rank >= 2 input")
    *lead, h, w = x.shape
    if th < h or tw < w:
        raise ValueError(f"target {(th, tw)} smaller than input {(h, w)}")
    if th == h and tw == w:
        return x  # nothing to pad

    n = math.prod(lead) if lead else 1
    out = _pad_flat(x.reshape((n, h, w)), th, tw)
    return out.reshape(tuple(lead) + (th, tw))


class PadToTarget:
    """JAX/Pallas equivalent of the PyTorch PadToTarget module."""

    def __init__(self, h, w, device=None):  # `device` kept for API parity, unused
        self.h = int(h)
        self.w = int(w)

    def __call__(self, t):
        x, y = t
        th, tw = self.h, self.w

        same_plane = (
            x.ndim >= 2
            and y.ndim >= 2
            and x.shape[-2:] == y.shape[-2:]
            and x.dtype == y.dtype
            and x.shape[-2:] != (th, tw)
        )
        small = (
            (x.size + y.size) * jnp.dtype(x.dtype).itemsize <= _FUSE_BYTES_THRESHOLD
            if same_plane
            else False
        )
        if same_plane and small:
            # Small-tensor fast path: one pallas_call for both tensors
            # (per-call dispatch + pipeline prologue dominates at this size,
            # and the longer fused n-axis gives megacore more to shard).
            h, w = x.shape[-2:]
            if th < h or tw < w:
                raise ValueError(f"target {(th, tw)} smaller than input {(h, w)}")
            nx = math.prod(x.shape[:-2]) if x.ndim > 2 else 1
            ny = math.prod(y.shape[:-2]) if y.ndim > 2 else 1
            xy = jnp.concatenate(
                [x.reshape((nx, h, w)), y.reshape((ny, h, w))], axis=0
            )
            out = _pad_flat(xy, th, tw)
            x_out = out[:nx].reshape(x.shape[:-2] + (th, tw))
            y_out = out[nx:].reshape(y.shape[:-2] + (th, tw))
            return (x_out, y_out)

        return (pad_to_target_2d(x, (th, tw)), pad_to_target_2d(y, (th, tw)))


if __name__ == "__main__":
    key = jax.random.PRNGKey(0)
    kx, ky = jax.random.split(key)

    # Small deterministic inputs: x is an image batch (B, C, H, W), y a
    # per-pixel target plane (B, H, W); both are padded to (TH, TW).
    B, C, H, W = 2, 4, 16, 16
    TH, TW = 24, 32
    x = jax.random.normal(kx, (B, C, H, W), dtype=jnp.float32)
    y = jax.random.normal(ky, (B, H, W), dtype=jnp.float32)

    mod = PadToTarget(TH, TW)
    x_out, y_out = mod((x, y))
    jax.block_until_ready((x_out, y_out))

    # Pure-JAX reference check (zero pad at bottom/right of last two dims).
    x_ref = jnp.pad(x, ((0, 0), (0, 0), (0, TH - H), (0, TW - W)))
    y_ref = jnp.pad(y, ((0, 0), (0, TH - H), (0, TW - W)))
    assert x_out.shape == (B, C, TH, TW) and x_out.dtype == x.dtype
    assert y_out.shape == (B, TH, TW) and y_out.dtype == y.dtype
    assert jnp.array_equal(x_out, x_ref)
    assert jnp.array_equal(y_out, y_ref)

    print("KERNEL_OK")
</pallas_src>

<mosaic_0001>
module attributes {stable_mosaic.version = 11 : i64} {
  func.func @_pad2d_kernel(%arg0: i32, %arg1: memref<5x16x16xf32, #tpu.memory_space<vmem>>, %arg2: memref<5x24x32xf32, #tpu.memory_space<vmem>>) attributes {dimension_semantics = [#tpu.dimension_semantics<parallel>], iteration_bounds = array<i64: 2>, scalar_prefetch = 0 : i64, scratch_operands = 0 : i64, tpu.core_type = #tpu.core_type<tc>, window_params = [{transform_indices = @transform_0, window_bounds = array<i64: 5, 16, 16>}, {transform_indices = @transform_1, window_bounds = array<i64: 5, 24, 32>}]} {
    %c0 = arith.constant 0 : index
    %c0_0 = arith.constant 0 : index
    %c0_1 = arith.constant 0 : index
    %0 = vector.load %arg1[%c0, %c0_0, %c0_1] : memref<5x16x16xf32, #tpu.memory_space<vmem>>, vector<5x16x16xf32>
    %cst = arith.constant 0.000000e+00 : f32
    %1 = vector.broadcast %cst : f32 to vector<5x16x16xf32>
    %2 = tpu.concatenate %0, %1 in 2 : vector<5x16x16xf32>, vector<5x16x16xf32> -> vector<5x16x32xf32>
    %cst_2 = arith.constant 0.000000e+00 : f32
    %3 = vector.broadcast %cst_2 : f32 to vector<5x8x32xf32>
    %4 = tpu.concatenate %2, %3 in 1 : vector<5x16x32xf32>, vector<5x8x32xf32> -> vector<5x24x32xf32>
    %c0_3 = arith.constant 0 : index
    %c0_4 = arith.constant 0 : index
    %c0_5 = arith.constant 0 : index
    %5 = vector.load %arg2[%c0_3, %c0_4, %c0_5] : memref<5x24x32xf32, #tpu.memory_space<vmem>>, vector<5x24x32xf32>
    tpu.vector_store %arg2[%c0_3, %c0_4, %c0_5], %4 {strides = array<i32>} : memref<5x24x32xf32, #tpu.memory_space<vmem>>, vector<5x24x32xf32>,
    return
  }
  func.func @transform_0(%arg0: i32) -> (i32, i32, i32) {
    %c0_i32 = arith.constant 0 : i32
    %c0_i32_0 = arith.constant 0 : i32
    %c0_i32_1 = arith.constant 0 : i32
    return %arg0, %c0_i32, %c0_i32_0 : i32, i32, i32
  }
  func.func @transform_1(%arg0: i32) -> (i32, i32, i32) {
    %c0_i32 = arith.constant 0 : i32
    %c0_i32_0 = arith.constant 0 : i32
    %c0_i32_1 = arith.constant 0 : i32
    return %arg0, %c0_i32, %c0_i32_0 : i32, i32, i32
  }
}

</mosaic_0001>

<bundles_post_ra>
// kernel: tpu_custom_call.1
= control target key start
LH: loop header
LB: loop body
LE: loop exit
PB: predicated region body
PF: predicated region fallthrough
CT: control target
= control target key end

     0   :  { %6 = vsyncpa [#allocation3], 0  ;;  %s658_s0 = inlined_call_operand.hbm [shape: f32[10,16,16], index: 0, kind: input, shape index: {}]   ;;  %s659_s1 = inlined_call_operand.hbm [shape: f32[10,24,32], index: 1, kind: output, shape index: {}]  }
   0x1   :  { %8 = vsyncpa [#allocation3 + $0x1], 0 }
   0x2   :  { %9 = vsyncpa [#allocation4], 0 }
   0x3   :  { %11 = vsyncpa [#allocation4 + $0x1], 0  ;;  %s446_s6 = smov 0   ;;  %s448_s7 = smov 0  }
   0x4   :  { %s450_s8 = smov 0   ;;  %s452_s9 = smov 0  }
   0x5 LB: > { %s467_s10 = sadd.s32 4294967295, %s427_s9   ;;  %s263_s11 = sadd.s32 4294967294, %s427_s9   ;;  %s427_s9 = sphi %s452_s9, %s671_s9   ;;  %s423_s8 = sphi %s450_s8, %s670_s8   ;;  %s419_s7 = sphi %s448_s7, %s669_s7   ;;  %s415_s6 = sphi %s446_s6, %s668_s6  }
   0x6   : > { %s471_s12 = sadd.s32 1, %s427_s9   ;;  %s24_s13 = sadd.s32 1, %s423_s8 }
   0x7   : > { %s21_s14 = ssub.s32 %s427_s9, %s471_s12  ;;  %p31_p0 = scmp.ne.s32.totalorder %s423_s8, %s419_s7 }
   0x8   : > { %p22_p1 = scmp.eq.s32.totalorder %s21_s14, 0  ;;  %p32_p2 = scmp.eq.s32.totalorder %s427_s9, 0 }
   0x9   : > { %p37_p3 = scmp.ne.s32.totalorder %s419_s7, %s415_s6  ;;  %p38_p4 = scmp.eq.s32.totalorder %s467_s10, 0 }
   0xa   : > { %s483_s15 = scalar_select %p22_p1, %s423_s8, %s24_s13  }
   0xb   : > { %p33_p5 = por %p32_p2, %p31_p0  ;;  %p485_p6 = por %p38_p4, %p37_p3 }
   0xc   : > { %p61_p7 = scmp.eq.s32.totalorder %s467_s10, 1  ;;  %p67_p8 = scmp.eq.s32.totalorder %s263_s11, 1 }
   0xd   : > { %p291_p10 = scmp.lt.s32.totalorder %s427_s9, 2  ;;  %s87_s19 = sand.u32 1, %s423_s8  }
   0xe   : > { %p492_p11 = por %p61_p7, %p31_p0  ;;  %p496_p12 = por %p67_p8, %p37_p3 }
   0xf   : > { %s274_s20 = smul.u32 1280, %s427_s9  ;;  %p507_p13 = pnand %p291_p10, %p33_p5 }
  0x10   : > { %s662_s17 = scalar_select %p492_p11, 1, 0 }
  0x11   : > { %s663_s18 = scalar_select %p496_p12, 1, 0 }
  0x12   : > { %s275_s21 = smul.u32 80, %s87_s19  ;;  %s505_s24 = scalar_lea.hbm %s658_s0, %s274_s20 }
  0x13   : > { %s513_s28 = scalar_lea.sflag [#allocation3], %s87_s19  ;;  %s331_s29 = scalar_lea.hbm %s505_s24, 1280 }
  0x14   : > { %s91_s26 = scalar_lea.vmem [#allocation2], %s275_s21  ;;  %p332_p0 = scmp.ne.s32.totalorder %s505_s24, %s331_s29 }
  0x15   : > { %s99_s27 = sshll.u32 %s91_s26, 4  ;;  %p333_p1 = pneg %p507_p13  ;;  %s511_s27 = int_to_ptr.vmem [resolvable:$true] %s99_s27 }
  0x16   : > { %s336_s3 = scalar_lea.hbm %s658_s0, 2560  ;;  %p337_p4 = scmp.lt.u32.totalorder %s505_s24, %s658_s0 }
  0x17   : > { %p334_p2 = pnand %p333_p1, %p332_p0  ;;  %p338_p5 = scmp.lt.u32.totalorder %s336_s3, %s331_s29 }
  0x18   : > { %p340_p8 = scmp.lt.u32.totalorder %s331_s29, %s505_s24 }
  0x19   : > { %p335_p3 = pneg %p334_p2  ;;  %p339_p7 = por %p338_p5, %p337_p4 }
  0x1b   : > { %p341_p10 = por %p340_p8, %p339_p7 }
  0x1d   : > { %p342_p9 = pnand %p341_p10, %p335_p3 }
  0x1f   : > { %345 = shalt.err (!%p342_p9)
}
  0x20   : > { %s346_s11 = scalar_lea.vmem %s511_s27, 1280  ;;  %s429_s13 = smov [#allocation2]  }
  0x21   : > { %p347_p0 = scmp.ne.s32.totalorder %s511_s27, %s346_s11  ;;  %s351_s14 = sshll.u32 %s429_s13, 4  ;;  %s352_s14 = int_to_ptr.vmem [resolvable:$false] %s351_s14 }
  0x22   : > { %s353_s19 = scalar_lea.vmem %s352_s14, 2560  ;;  %p354_p11 = scmp.lt.s32.totalorder %s511_s27, %s352_s14 }
  0x23   : > { %p349_p2 = pnand %p347_p0, %p333_p1  ;;  %p355_p4 = scmp.lt.s32.totalorder %s353_s19, %s346_s11 }
  0x25   : > { %p350_p12 = pneg %p349_p2  ;;  %p356_p5 = por %p355_p4, %p354_p11 }
  0x27   : > { %p357_p7 = pnand %p356_p5, %p350_p12 }
  0x29   : > { %360 = shalt.err (!%p357_p7)
}
  0x2a   : > { %s430_s20 = smov 128   ;;  %s431_s21 = smov 8  }
  0x2b   : > { %286 = dma.hbm_to_vmem [thread:$0]  (!%p507_p13), %s505_s24, 1280, %s511_s27, %s513_s28, %s430_s20, %s430_s20, %s431_s21  }
  0x2c   : > { %p268_p9 = scmp.ge.s32.totalorder %s427_s9, 1  ;;  %p107_p1 = scmp.lt.s32.totalorder %s427_s9, 3 }
  0x2e   : > { %p108_p3 = pnand %p268_p9, %p107_p1 }
  0x2f   : > { %s544_s22 = sand.u32 (!%p108_p3), 1, %s419_s7  }
  0x30   : > { %111 = sbr.rel (%p108_p3) target bundleno = 85 (0x55), region = 24  ;;  %s114_s26 = scalar_lea.sflag (!%p108_p3), [#allocation3], %s544_s22 }
  0x31   : > { %s276_s23 = smul.u32 (!%p108_p3), 80, %s544_s22 }
  0x33   : > { %s548_s29 = scalar_lea.vmem (!%p108_p3), [#allocation2], %s276_s23 }
  0x37   : > { %406 = dma.done.wait (%p485_p6), %s114_s26, 1280  }
  0x38   : > { %408 = vsyncadd (%p485_p6), %s114_s26, 4294966016  ;;  %s277_s24 = smul.u32 120, %s544_s22  ;;  %vm159_vm0 = vcmask 261120   ;;  %v432_v0 = vmov 0.0   ;;  %vm148_vm1 = vcmask 130048   ;;  %v138_v1 = vld [vmem:[%s548_s29] sm:$0xff] }
  0x39   : > { %s292_s16 = smul.u32 1920, %s467_s10  ;;  %v139_v2 = vld [vmem:[%s548_s29 + $0x8] sm:$0xff]  ;;  %v140_v3 = vld [vmem:[%s548_s29 + $0x10] sm:$0xff]  ;;  %v149_v4 = vsel %vm148_vm1, %v138_v1, 0.0  ;;  %v141_v7 = vld [vmem:[%s548_s29 + $0x18] sm:$0xff]  ;;  %s176_s2 = scalar_lea.sflag [#allocation4], %s544_s22 }
  0x3a   : > { %s555_s25 = scalar_lea.vmem [#allocation5], %s277_s24  ;;  %v150_v5 = vsel %vm148_vm1, %v139_v2, 0.0  ;;  %v151_v6 = vsel %vm148_vm1, %v140_v3, 0.0  ;;  %v142_v8 = vld [vmem:[%s548_s29 + $0x20] sm:$0xff]  ;;  %v143_v9 = vld [vmem:[%s548_s29 + $0x28] sm:$0xff]  ;;  %v152_v10 = vsel %vm148_vm1, %v141_v7, 0.0 }
  0x3b   : > { %162 = vst.msk [vmem:[%s555_s25 + $0x10] sm:$0xff] %vm159_vm0, %v432_v0  ;;  %165 = vst.msk [vmem:[%s555_s25 + $0x28] sm:$0xff] %vm159_vm0, %v432_v0  ;;  %s190_s27 = sshll.u32 %s555_s25, 4  ;;  %v153_v11 = vsel %vm148_vm1, %v142_v8, 0.0  ;;  %v154_v12 = vsel %vm148_vm1, %v143_v9, 0.0  ;;  %v144_v13 = vld [vmem:[%s548_s29 + $0x30] sm:$0xff]  ;;  %s603_s30 = scalar_lea.hbm %s659_s1, %s292_s16  ;;  %s605_s27 = int_to_ptr.vmem [resolvable:$true] %s190_s27 }
  0x3c   : > { %168 = vst.msk [vmem:[%s555_s25 + $0x40] sm:$0xff] %vm159_vm0, %v432_v0  ;;  %171 = vst.msk [vmem:[%s555_s25 + $0x58] sm:$0xff] %vm159_vm0, %v432_v0  ;;  %v145_v14 = vld [vmem:[%s548_s29 + $0x38] sm:$0xff]  ;;  %v146_v15 = vld [vmem:[%s548_s29 + $0x40] sm:$0xff]  ;;  %v155_v16 = vsel %vm148_vm1, %v144_v13, 0.0  ;;  %s361_s3 = scalar_lea.vmem %s605_s27, 1920 }
  0x3d   : > { %174 = vst.msk [vmem:[%s555_s25 + $0x70] sm:$0xff] %vm159_vm0, %v432_v0  ;;  %160 = vst.msk [vmem:[%s555_s25] sm:$0xff] %vm159_vm0, %v149_v4  ;;  %v156_v17 = vsel %vm148_vm1, %v145_v14, 0.0  ;;  %v157_v18 = vsel %vm148_vm1, %v146_v15, 0.0  ;;  %v147_v19 = vld [vmem:[%s548_s29 + $0x48] sm:$0xff]  ;;  %p362_p6 = scmp.ne.s32.totalorder %s605_s27, %s361_s3  ;;  %p665_p11 = scmp.ne.s32.totalorder %s662_s17, 0 }
  0x3e   : > { %161 = vst.msk [vmem:[%s555_s25 + $0x8] sm:$0xff] %vm159_vm0, %v150_v5  ;;  %163 = vst.msk [vmem:[%s555_s25 + $0x18] sm:$0xff] %vm159_vm0, %v151_v6  ;;  %v158_v20 = vsel %vm148_vm1, %v147_v19, 0.0  ;;  %s433_s4 = smov [#allocation5]  }
  0x3f   : > { %164 = vst.msk [vmem:[%s555_s25 + $0x20] sm:$0xff] %vm159_vm0, %v152_v10  ;;  %166 = vst.msk [vmem:[%s555_s25 + $0x30] sm:$0xff] %vm159_vm0, %v153_v11  ;;  %p363_p12 = pnand %p362_p6, %p665_p11  ;;  %s365_s5 = sshll.u32 %s433_s4, 4  ;;  %s366_s5 = int_to_ptr.vmem [resolvable:$false] %s365_s5 }
  0x40   : > { %167 = vst.msk [vmem:[%s555_s25 + $0x38] sm:$0xff] %vm159_vm0, %v154_v12  ;;  %169 = vst.msk [vmem:[%s555_s25 + $0x48] sm:$0xff] %vm159_vm0, %v155_v16  ;;  %s367_s11 = scalar_lea.vmem %s366_s5, 3840  ;;  %p368_p8 = scmp.lt.s32.totalorder %s605_s27, %s366_s5 }
  0x41   : > { %170 = vst.msk [vmem:[%s555_s25 + $0x50] sm:$0xff] %vm159_vm0, %v156_v17  ;;  %172 = vst.msk [vmem:[%s555_s25 + $0x60] sm:$0xff] %vm159_vm0, %v157_v18  ;;  %p364_p13 = pneg %p363_p12  ;;  %p369_p10 = scmp.lt.s32.totalorder %s367_s11, %s361_s3 }
  0x42   : > { %173 = vst.msk [vmem:[%s555_s25 + $0x68] sm:$0xff] %vm159_vm0, %v158_v20 }
  0x43   : > { %p370_p0 = por %p369_p10, %p368_p8 }
  0x45   : > { %p371_p2 = pnand %p370_p0, %p364_p13 }
  0x47   : > { %374 = shalt.err (!%p371_p2)
}
  0x48   : > { %s375_s13 = scalar_lea.hbm %s603_s30, 1920  ;;  %s379_s20 = scalar_lea.hbm %s659_s1, 3840 }
  0x49   : > { %p376_p4 = scmp.ne.s32.totalorder %s603_s30, %s375_s13  ;;  %p380_p9 = scmp.lt.u32.totalorder %s603_s30, %s659_s1 }
  0x4a   : > { %p381_p1 = scmp.lt.u32.totalorder %s379_s20, %s375_s13  ;;  %p383_p6 = scmp.lt.u32.totalorder %s375_s13, %s603_s30 }
  0x4b   : > { %p377_p5 = pnand %p376_p4, %p665_p11 }
  0x4c   : > { %p382_p3 = por %p381_p1, %p380_p9 }
  0x4d   : > { %p378_p7 = pneg %p377_p5 }
  0x4e   : > { %p384_p12 = por %p383_p6, %p382_p3 }
  0x50   : > { %p385_p13 = pnand %p384_p12, %p378_p7 }
  0x52   : > { %388 = shalt.err (!%p385_p13)
}
  0x53   : > { %s434_s26 = smov 128   ;;  %s435_s29 = smov 8  }
  0x54   : > { %281 = dma.vmem_to_hbm [thread:$0]  (%p665_p11), %s605_s27, 1920, %s603_s30, %s176_s2, %s434_s26, %s434_s26, %s435_s29  }
  0x55 PF: > { %s205_s24 = sand.u32 1, %s415_s6   ;;  %p666_p8 = scmp.ne.s32.totalorder %s663_s18, 0 }
  0x56   : > { %p667_p10 = scmp.ge.s32.totalorder %s427_s9, 2  ;;  %s206_s25 = scalar_lea.sflag [#allocation4], %s205_s24 }
  0x58   : > { %p288_p0 = pnand %p667_p10, %p666_p8 }
  0x5a   : > { %410 = dma.done.wait (!%p288_p0), %s206_s25, 1920  }
  0x5b   : > { %412 = vsyncadd (!%p288_p0), %s206_s25, 4294965376  ;;  %p14_p2 = scmp.ge.s32.totalorder %s471_s12, 4   ;;  %s668_s6 = smov %s419_s7 }
  0x5c   : > { %s669_s7 = smov %s423_s8  ;;  %s670_s8 = smov %s483_s15 }
  0x5d   : > { %s671_s9 = smov %s471_s12  ;;  %16 = sbr.rel (!%p14_p2) target bundleno = 5 (0x5), region = 69 }
  0x64   :  { %211 = vsyncpa [#allocation3], 1 }
  0x65   :  { %213 = vsyncpa [#allocation3 + $0x1], 1 }
  0x66   :  { %214 = vsyncpa [#allocation4], 1 }
  0x67   :  { %216 = vsyncpa [#allocation4 + $0x1], 1 }

</bundles_post_ra>
